<compile_context>
chip_gen: v7x
topology: tpu7x:2x2x1
jax: 0.10.0
libtpu: 0.0.40
codegen_flags: <defaults>
</compile_context>

<pallas_src>
import functools
import math

import jax
import jax.numpy as jnp
from jax import lax
from jax.experimental import pallas as pl
from jax.experimental.pallas import tpu as pltpu


def _mha_kernel(q_ref, k_ref, v_ref,
                wq_ref, bq_ref, wk_ref, bk_ref, wv_ref, bv_ref,
                wo_ref, bo_ref,
                *rest,
                n_heads: int, d_head: int, b_blk: int, lq: int, lk: int,
                with_attn: bool):
    if with_attn:
        out_ref, attn_ref, ctx_scratch = rest
    else:
        out_ref, ctx_scratch = rest
        attn_ref = None

    d_model = n_heads * d_head
    in_dt = q_ref.dtype
    scale = 1.0 / math.sqrt(d_head)

    # ---- Q/K/V projections --------------------------------------------------
    # Fold (batch_block, seq) into the matmul M dimension: one big matmul per
    # projection, operands in native dtype, f32 accumulation on the MXU.
    q2 = q_ref[...].reshape(b_blk * lq, d_model)
    k2 = k_ref[...].reshape(b_blk * lk, d_model)
    v2 = v_ref[...].reshape(b_blk * lk, d_model)

    qp = jnp.dot(q2, wq_ref[...], preferred_element_type=jnp.float32) + bq_ref[...]
    kp = jnp.dot(k2, wk_ref[...], preferred_element_type=jnp.float32) + bk_ref[...]
    vp = jnp.dot(v2, wv_ref[...], preferred_element_type=jnp.float32) + bv_ref[...]

    qp = qp.astype(in_dt)   # feed the attention matmuls in the input dtype
    kp = kp.astype(in_dt)
    vp = vp.astype(in_dt)

    # ---- split heads (static lane slices, stacked into a batch axis) --------
    # Shapes: (b_blk * n_heads, L, d_head).  Only minor-dim-preserving reshapes
    # and static slices are used (robust Mosaic lowering).
    def _stack_heads(x2d, length):
        tiles = []
        for bi in range(b_blk):
            rows = x2d[bi * length:(bi + 1) * length, :]
            for h in range(n_heads):
                tiles.append(rows[:, h * d_head:(h + 1) * d_head][None])
        return jnp.concatenate(tiles, axis=0)

    qh = _stack_heads(qp, lq)   # (b_blk*H, Lq, dh)
    kh = _stack_heads(kp, lk)   # (b_blk*H, Lk, dh)
    vh = _stack_heads(vp, lk)   # (b_blk*H, Lk, dh)

    # ---- scaled dot-product attention, all (batch, head) pairs batched ------
    # scores: (b_blk*H, Lq, Lk); contraction over d_head, no explicit transpose.
    scores = lax.dot_general(
        qh, kh,
        dimension_numbers=(((2,), (2,)), ((0,), (0,))),
        preferred_element_type=jnp.float32) * scale

    # numerically stable softmax over keys; elementwise math kept in f32.
    scores = scores - jnp.max(scores, axis=-1, keepdims=True)
    p = jnp.exp(scores)
    denom = jnp.sum(p, axis=-1, keepdims=True)
    attn = p * pl.reciprocal(denom, approx=True)        # EUP slot (free-ish)

    if attn_ref is not None:
        # single store, layout (b_blk, H*Lq, Lk): a free leading-dim reshape.
        attn_ref[...] = attn.reshape(b_blk, n_heads * lq, lk).astype(attn_ref.dtype)

    # context: (b_blk*H, Lq, dh) = attn @ V, head-batched.
    ctx = lax.dot_general(
        attn.astype(in_dt), vh,
        dimension_numbers=(((2,), (1,)), ((0,), (0,))),
        preferred_element_type=jnp.float32)

    # Scatter each head-group into its column slice of the VMEM scratch
    # (plain masked stores; bounds live ranges, no concatenate).
    for bi in range(b_blk):
        for h in range(n_heads):
            ctx_scratch[bi * lq:(bi + 1) * lq,
                        h * d_head:(h + 1) * d_head] = ctx[bi * n_heads + h]

    # ---- output projection over the whole batch block -----------------------
    out = jnp.dot(ctx_scratch[...].astype(in_dt), wo_ref[...],
                  preferred_element_type=jnp.float32) + bo_ref[...]
    out_ref[...] = out.reshape(b_blk, lq, d_model).astype(out_ref.dtype)


def _pick_batch_block(batch, max_block):
    bb = max(1, min(batch, max_block))
    while batch % bb:
        bb -= 1
    return bb


def multi_head_attention(query, key, value, params, *, n_heads: int,
                         batch_block: int = 8, return_attention: bool = True):
    """Pallas implementation of MultiHeadAttention.forward (no masks, no cache).

    Returns (final_output, attention) matching the PyTorch module (cache=None):
      final_output: (B, Lq, d_model)
      attention:    (B, n_heads, Lq, Lk)  (or None if return_attention=False)
    """
    B, Lq, D = query.shape
    _, Lk, _ = key.shape
    assert D % n_heads == 0, "d_model must be divisible by n_heads"
    assert value.shape[1] == Lk
    d_head = D // n_heads
    b_blk = _pick_batch_block(B, batch_block)

    (wq, bq), (wk, bk), (wv, bv), (wo, bo) = params
    # nn.Linear stores weight as (out, in); pre-transpose so kernel does x @ W.
    wq_t, wk_t, wv_t, wo_t = wq.T, wk.T, wv.T, wo.T
    bq2, bk2, bv2, bo2 = (b.reshape(1, D) for b in (bq, bk, bv, bo))

    kernel = functools.partial(_mha_kernel, n_heads=n_heads, d_head=d_head,
                               b_blk=b_blk, lq=Lq, lk=Lk,
                               with_attn=return_attention)

    # TODO(synk): for production d_model on v7x (64 MiB VMEM), single-buffer the
    # resident weights (pipeline_mode=pl.Buffered(1)) and set vmem_limit_bytes.
    weight_spec = pl.BlockSpec((D, D), lambda i: (0, 0))
    bias_spec = pl.BlockSpec((1, D), lambda i: (0, 0))
    io_spec = pl.BlockSpec((b_blk, Lq, D), lambda i: (i, 0, 0))
    kv_spec = pl.BlockSpec((b_blk, Lk, D), lambda i: (i, 0, 0))

    if return_attention:
        out_shape = (jax.ShapeDtypeStruct((B, Lq, D), query.dtype),
                     jax.ShapeDtypeStruct((B, n_heads * Lq, Lk), jnp.float32))
        out_specs = [io_spec,
                     pl.BlockSpec((b_blk, n_heads * Lq, Lk), lambda i: (i, 0, 0))]
    else:
        out_shape = jax.ShapeDtypeStruct((B, Lq, D), query.dtype)
        out_specs = io_spec

    results = pl.pallas_call(
        kernel,
        out_shape=out_shape,
        grid_spec=pltpu.PrefetchScalarGridSpec(
            num_scalar_prefetch=0,
            grid=(B // b_blk,),
            in_specs=[
                io_spec, kv_spec, kv_spec,                 # query, key, value
                weight_spec, bias_spec,                    # Wq, bq
                weight_spec, bias_spec,                    # Wk, bk
                weight_spec, bias_spec,                    # Wv, bv
                weight_spec, bias_spec,                    # Wo, bo
            ],
            out_specs=out_specs,
            scratch_shapes=[pltpu.VMEM((b_blk * Lq, D), jnp.float32)],
        ),
        compiler_params=pltpu.CompilerParams(
            dimension_semantics=("parallel",)),
    )(query, key, value,
      wq_t, bq2, wk_t, bk2, wv_t, bv2, wo_t, bo2)

    if return_attention:
        out, attn_packed = results
        attn = attn_packed.reshape(B, n_heads, Lq, Lk)
        return out, attn
    return results, None


def _reference(query, key, value, params, n_heads):
    """Pure-JAX reference matching the PyTorch module (eval mode, no masks)."""
    (wq, bq), (wk, bk), (wv, bv), (wo, bo) = params
    B, Lq, D = query.shape
    Lk = key.shape[1]
    dh = D // n_heads
    qp = query @ wq.T + bq
    kp = key @ wk.T + bk
    vp = value @ wv.T + bv
    qh = qp.reshape(B, Lq, n_heads, dh).transpose(0, 2, 1, 3)
    kh = kp.reshape(B, Lk, n_heads, dh).transpose(0, 2, 1, 3)
    vh = vp.reshape(B, Lk, n_heads, dh).transpose(0, 2, 1, 3)
    scores = jnp.einsum('bhqd,bhkd->bhqk', qh, kh) / math.sqrt(dh)
    attn = jax.nn.softmax(scores, axis=-1)
    ctx = jnp.einsum('bhqk,bhkd->bhqd', attn, vh)
    ctx = ctx.transpose(0, 2, 1, 3).reshape(B, Lq, D)
    out = ctx @ wo.T + bo
    return out, attn


def init_linear(key, d_in, d_out):
    """Deterministic nn.Linear-style init: U(-1/sqrt(d_in), 1/sqrt(d_in))."""
    kw, kb = jax.random.split(key)
    bound = 1.0 / math.sqrt(d_in)
    w = jax.random.uniform(kw, (d_out, d_in), jnp.float32, -bound, bound)
    b = jax.random.uniform(kb, (d_out,), jnp.float32, -bound, bound)
    return w, b


if __name__ == "__main__":
    # Small shapes consistent with the module: d_model=32, n_heads=4, seq=8.
    batch, seq_len, d_model, n_heads = 2, 8, 32, 4

    root = jax.random.PRNGKey(0)
    k_q, k_k, k_v, k_params = jax.random.split(root, 4)
    query = jax.random.normal(k_q, (batch, seq_len, d_model), jnp.float32)
    key = jax.random.normal(k_k, (batch, seq_len, d_model), jnp.float32)
    value = jax.random.normal(k_v, (batch, seq_len, d_model), jnp.float32)

    pkeys = jax.random.split(k_params, 4)
    params = tuple(init_linear(pk, d_model, d_model) for pk in pkeys)

    out, attn = multi_head_attention(query, key, value, params, n_heads=n_heads)
    jax.block_until_ready((out, attn))
    assert out.shape == (batch, seq_len, d_model)
    assert attn.shape == (batch, n_heads, seq_len, seq_len)

    out_ref, attn_ref = _reference(query, key, value, params, n_heads)
    # Loose tolerance: softmax denominator uses the approximate EUP reciprocal.
    assert jnp.allclose(out, out_ref, rtol=2e-2, atol=2e-2)
    assert jnp.allclose(attn, attn_ref, rtol=2e-2, atol=2e-2)

    # Fast path that skips the (dominant) attention-probability HBM write.
    out_only, _ = multi_head_attention(query, key, value, params,
                                       n_heads=n_heads, return_attention=False)
    jax.block_until_ready(out_only)
    assert out_only.shape == (batch, seq_len, d_model)
    assert jnp.allclose(out_only, out_ref, rtol=2e-2, atol=2e-2)

    print("KERNEL_OK")
</pallas_src>

<mosaic_0001>
module attributes {stable_mosaic.version = 11 : i64} {
  func.func @_mha_kernel(%arg0: i32, %arg1: memref<2x8x32xf32, #tpu.memory_space<vmem>>, %arg2: memref<2x8x32xf32, #tpu.memory_space<vmem>>, %arg3: memref<2x8x32xf32, #tpu.memory_space<vmem>>, %arg4: memref<32x32xf32, #tpu.memory_space<vmem>>, %arg5: memref<1x32xf32, #tpu.memory_space<vmem>>, %arg6: memref<32x32xf32, #tpu.memory_space<vmem>>, %arg7: memref<1x32xf32, #tpu.memory_space<vmem>>, %arg8: memref<32x32xf32, #tpu.memory_space<vmem>>, %arg9: memref<1x32xf32, #tpu.memory_space<vmem>>, %arg10: memref<32x32xf32, #tpu.memory_space<vmem>>, %arg11: memref<1x32xf32, #tpu.memory_space<vmem>>, %arg12: memref<2x8x32xf32, #tpu.memory_space<vmem>>, %arg13: memref<2x32x8xf32, #tpu.memory_space<vmem>>, %arg14: memref<16x32xf32, #tpu.memory_space<vmem>>) attributes {dimension_semantics = [#tpu.dimension_semantics<parallel>], iteration_bounds = array<i64: 1>, scalar_prefetch = 0 : i64, scratch_operands = 1 : i64, tpu.core_type = #tpu.core_type<tc>, window_params = [{transform_indices = @transform_0, window_bounds = array<i64: 2, 8, 32>}, {transform_indices = @transform_1, window_bounds = array<i64: 2, 8, 32>}, {transform_indices = @transform_2, window_bounds = array<i64: 2, 8, 32>}, {pipeline_mode = #tpu.pipeline_mode<synchronous>, transform_indices = @transform_3, window_bounds = array<i64: 32, 32>}, {pipeline_mode = #tpu.pipeline_mode<synchronous>, transform_indices = @transform_4, window_bounds = array<i64: 1, 32>}, {pipeline_mode = #tpu.pipeline_mode<synchronous>, transform_indices = @transform_5, window_bounds = array<i64: 32, 32>}, {pipeline_mode = #tpu.pipeline_mode<synchronous>, transform_indices = @transform_6, window_bounds = array<i64: 1, 32>}, {pipeline_mode = #tpu.pipeline_mode<synchronous>, transform_indices = @transform_7, window_bounds = array<i64: 32, 32>}, {pipeline_mode = #tpu.pipeline_mode<synchronous>, transform_indices = @transform_8, window_bounds = array<i64: 1, 32>}, {pipeline_mode = #tpu.pipeline_mode<synchronous>, transform_indices = @transform_9, window_bounds = array<i64: 32, 32>}, {pipeline_mode = #tpu.pipeline_mode<synchronous>, transform_indices = @transform_10, window_bounds = array<i64: 1, 32>}, {transform_indices = @transform_11, window_bounds = array<i64: 2, 8, 32>}, {transform_indices = @transform_12, window_bounds = array<i64: 2, 32, 8>}]} {
    %c0 = arith.constant 0 : index
    %c0_0 = arith.constant 0 : index
    %c0_1 = arith.constant 0 : index
    %0 = vector.load %arg1[%c0, %c0_0, %c0_1] : memref<2x8x32xf32, #tpu.memory_space<vmem>>, vector<2x8x32xf32>
    %1 = vector.shape_cast %0 : vector<2x8x32xf32> to vector<16x32xf32>
    %c0_2 = arith.constant 0 : index
    %c0_3 = arith.constant 0 : index
    %c0_4 = arith.constant 0 : index
    %2 = vector.load %arg2[%c0_2, %c0_3, %c0_4] : memref<2x8x32xf32, #tpu.memory_space<vmem>>, vector<2x8x32xf32>
    %3 = vector.shape_cast %2 : vector<2x8x32xf32> to vector<16x32xf32>
    %c0_5 = arith.constant 0 : index
    %c0_6 = arith.constant 0 : index
    %c0_7 = arith.constant 0 : index
    %4 = vector.load %arg3[%c0_5, %c0_6, %c0_7] : memref<2x8x32xf32, #tpu.memory_space<vmem>>, vector<2x8x32xf32>
    %5 = vector.shape_cast %4 : vector<2x8x32xf32> to vector<16x32xf32>
    %c0_8 = arith.constant 0 : index
    %c0_9 = arith.constant 0 : index
    %6 = vector.load %arg4[%c0_8, %c0_9] : memref<32x32xf32, #tpu.memory_space<vmem>>, vector<32x32xf32>
    %cst = arith.constant dense<0.000000e+00> : vector<16x32xf32>
    %7 = tpu.matmul %1, %6, %cst {dimension_numbers = #tpu.dot_dimension_numbers<[1], [0], [0], [1], [0, 0, 1, 1], [], []>} : vector<16x32xf32>, vector<32x32xf32>, vector<16x32xf32> -> vector<16x32xf32>
    %c0_10 = arith.constant 0 : index
    %c0_11 = arith.constant 0 : index
    %8 = vector.load %arg5[%c0_10, %c0_11] : memref<1x32xf32, #tpu.memory_space<vmem>>, vector<1x32xf32>
    %9 = vector.broadcast %8 : vector<1x32xf32> to vector<16x32xf32>
    %10 = arith.addf %7, %9 : vector<16x32xf32>
    %c0_12 = arith.constant 0 : index
    %c0_13 = arith.constant 0 : index
    %11 = vector.load %arg6[%c0_12, %c0_13] : memref<32x32xf32, #tpu.memory_space<vmem>>, vector<32x32xf32>
    %cst_14 = arith.constant dense<0.000000e+00> : vector<16x32xf32>
    %12 = tpu.matmul %3, %11, %cst_14 {dimension_numbers = #tpu.dot_dimension_numbers<[1], [0], [0], [1], [0, 0, 1, 1], [], []>} : vector<16x32xf32>, vector<32x32xf32>, vector<16x32xf32> -> vector<16x32xf32>
    %c0_15 = arith.constant 0 : index
    %c0_16 = arith.constant 0 : index
    %13 = vector.load %arg7[%c0_15, %c0_16] : memref<1x32xf32, #tpu.memory_space<vmem>>, vector<1x32xf32>
    %14 = vector.broadcast %13 : vector<1x32xf32> to vector<16x32xf32>
    %15 = arith.addf %12, %14 : vector<16x32xf32>
    %c0_17 = arith.constant 0 : index
    %c0_18 = arith.constant 0 : index
    %16 = vector.load %arg8[%c0_17, %c0_18] : memref<32x32xf32, #tpu.memory_space<vmem>>, vector<32x32xf32>
    %cst_19 = arith.constant dense<0.000000e+00> : vector<16x32xf32>
    %17 = tpu.matmul %5, %16, %cst_19 {dimension_numbers = #tpu.dot_dimension_numbers<[1], [0], [0], [1], [0, 0, 1, 1], [], []>} : vector<16x32xf32>, vector<32x32xf32>, vector<16x32xf32> -> vector<16x32xf32>
    %c0_20 = arith.constant 0 : index
    %c0_21 = arith.constant 0 : index
    %18 = vector.load %arg9[%c0_20, %c0_21] : memref<1x32xf32, #tpu.memory_space<vmem>>, vector<1x32xf32>
    %19 = vector.broadcast %18 : vector<1x32xf32> to vector<16x32xf32>
    %20 = arith.addf %17, %19 : vector<16x32xf32>
    %21 = vector.extract_strided_slice %10 {offsets = [0, 0], sizes = [8, 32], strides = [1, 1]} : vector<16x32xf32> to vector<8x32xf32>
    %22 = vector.extract_strided_slice %21 {offsets = [0, 0], sizes = [8, 8], strides = [1, 1]} : vector<8x32xf32> to vector<8x8xf32>
    %23 = vector.shape_cast %22 : vector<8x8xf32> to vector<1x8x8xf32>
    %24 = vector.extract_strided_slice %21 {offsets = [0, 8], sizes = [8, 8], strides = [1, 1]} : vector<8x32xf32> to vector<8x8xf32>
    %25 = vector.shape_cast %24 : vector<8x8xf32> to vector<1x8x8xf32>
    %26 = vector.extract_strided_slice %21 {offsets = [0, 16], sizes = [8, 8], strides = [1, 1]} : vector<8x32xf32> to vector<8x8xf32>
    %27 = vector.shape_cast %26 : vector<8x8xf32> to vector<1x8x8xf32>
    %28 = vector.extract_strided_slice %21 {offsets = [0, 24], sizes = [8, 8], strides = [1, 1]} : vector<8x32xf32> to vector<8x8xf32>
    %29 = vector.shape_cast %28 : vector<8x8xf32> to vector<1x8x8xf32>
    %30 = vector.extract_strided_slice %10 {offsets = [8, 0], sizes = [8, 32], strides = [1, 1]} : vector<16x32xf32> to vector<8x32xf32>
    %31 = vector.extract_strided_slice %30 {offsets = [0, 0], sizes = [8, 8], strides = [1, 1]} : vector<8x32xf32> to vector<8x8xf32>
    %32 = vector.shape_cast %31 : vector<8x8xf32> to vector<1x8x8xf32>
    %33 = vector.extract_strided_slice %30 {offsets = [0, 8], sizes = [8, 8], strides = [1, 1]} : vector<8x32xf32> to vector<8x8xf32>
    %34 = vector.shape_cast %33 : vector<8x8xf32> to vector<1x8x8xf32>
    %35 = vector.extract_strided_slice %30 {offsets = [0, 16], sizes = [8, 8], strides = [1, 1]} : vector<8x32xf32> to vector<8x8xf32>
    %36 = vector.shape_cast %35 : vector<8x8xf32> to vector<1x8x8xf32>
    %37 = vector.extract_strided_slice %30 {offsets = [0, 24], sizes = [8, 8], strides = [1, 1]} : vector<8x32xf32> to vector<8x8xf32>
    %38 = vector.shape_cast %37 : vector<8x8xf32> to vector<1x8x8xf32>
    %39 = tpu.concatenate %23, %25, %27, %29, %32, %34, %36, %38 in 0 : vector<1x8x8xf32>, vector<1x8x8xf32>, vector<1x8x8xf32>, vector<1x8x8xf32>, vector<1x8x8xf32>, vector<1x8x8xf32>, vector<1x8x8xf32>, vector<1x8x8xf32> -> vector<8x8x8xf32>
    %40 = vector.extract_strided_slice %15 {offsets = [0, 0], sizes = [8, 32], strides = [1, 1]} : vector<16x32xf32> to vector<8x32xf32>
    %41 = vector.extract_strided_slice %40 {offsets = [0, 0], sizes = [8, 8], strides = [1, 1]} : vector<8x32xf32> to vector<8x8xf32>
    %42 = vector.shape_cast %41 : vector<8x8xf32> to vector<1x8x8xf32>
    %43 = vector.extract_strided_slice %40 {offsets = [0, 8], sizes = [8, 8], strides = [1, 1]} : vector<8x32xf32> to vector<8x8xf32>
    %44 = vector.shape_cast %43 : vector<8x8xf32> to vector<1x8x8xf32>
    %45 = vector.extract_strided_slice %40 {offsets = [0, 16], sizes = [8, 8], strides = [1, 1]} : vector<8x32xf32> to vector<8x8xf32>
    %46 = vector.shape_cast %45 : vector<8x8xf32> to vector<1x8x8xf32>
    %47 = vector.extract_strided_slice %40 {offsets = [0, 24], sizes = [8, 8], strides = [1, 1]} : vector<8x32xf32> to vector<8x8xf32>
    %48 = vector.shape_cast %47 : vector<8x8xf32> to vector<1x8x8xf32>
    %49 = vector.extract_strided_slice %15 {offsets = [8, 0], sizes = [8, 32], strides = [1, 1]} : vector<16x32xf32> to vector<8x32xf32>
    %50 = vector.extract_strided_slice %49 {offsets = [0, 0], sizes = [8, 8], strides = [1, 1]} : vector<8x32xf32> to vector<8x8xf32>
    %51 = vector.shape_cast %50 : vector<8x8xf32> to vector<1x8x8xf32>
    %52 = vector.extract_strided_slice %49 {offsets = [0, 8], sizes = [8, 8], strides = [1, 1]} : vector<8x32xf32> to vector<8x8xf32>
    %53 = vector.shape_cast %52 : vector<8x8xf32> to vector<1x8x8xf32>
    %54 = vector.extract_strided_slice %49 {offsets = [0, 16], sizes = [8, 8], strides = [1, 1]} : vector<8x32xf32> to vector<8x8xf32>
    %55 = vector.shape_cast %54 : vector<8x8xf32> to vector<1x8x8xf32>
    %56 = vector.extract_strided_slice %49 {offsets = [0, 24], sizes = [8, 8], strides = [1, 1]} : vector<8x32xf32> to vector<8x8xf32>
    %57 = vector.shape_cast %56 : vector<8x8xf32> to vector<1x8x8xf32>
    %58 = tpu.concatenate %42, %44, %46, %48, %51, %53, %55, %57 in 0 : vector<1x8x8xf32>, vector<1x8x8xf32>, vector<1x8x8xf32>, vector<1x8x8xf32>, vector<1x8x8xf32>, vector<1x8x8xf32>, vector<1x8x8xf32>, vector<1x8x8xf32> -> vector<8x8x8xf32>
    %59 = vector.extract_strided_slice %20 {offsets = [0, 0], sizes = [8, 32], strides = [1, 1]} : vector<16x32xf32> to vector<8x32xf32>
    %60 = vector.extract_strided_slice %59 {offsets = [0, 0], sizes = [8, 8], strides = [1, 1]} : vector<8x32xf32> to vector<8x8xf32>
    %61 = vector.shape_cast %60 : vector<8x8xf32> to vector<1x8x8xf32>
    %62 = vector.extract_strided_slice %59 {offsets = [0, 8], sizes = [8, 8], strides = [1, 1]} : vector<8x32xf32> to vector<8x8xf32>
    %63 = vector.shape_cast %62 : vector<8x8xf32> to vector<1x8x8xf32>
    %64 = vector.extract_strided_slice %59 {offsets = [0, 16], sizes = [8, 8], strides = [1, 1]} : vector<8x32xf32> to vector<8x8xf32>
    %65 = vector.shape_cast %64 : vector<8x8xf32> to vector<1x8x8xf32>
    %66 = vector.extract_strided_slice %59 {offsets = [0, 24], sizes = [8, 8], strides = [1, 1]} : vector<8x32xf32> to vector<8x8xf32>
    %67 = vector.shape_cast %66 : vector<8x8xf32> to vector<1x8x8xf32>
    %68 = vector.extract_strided_slice %20 {offsets = [8, 0], sizes = [8, 32], strides = [1, 1]} : vector<16x32xf32> to vector<8x32xf32>
    %69 = vector.extract_strided_slice %68 {offsets = [0, 0], sizes = [8, 8], strides = [1, 1]} : vector<8x32xf32> to vector<8x8xf32>
    %70 = vector.shape_cast %69 : vector<8x8xf32> to vector<1x8x8xf32>
    %71 = vector.extract_strided_slice %68 {offsets = [0, 8], sizes = [8, 8], strides = [1, 1]} : vector<8x32xf32> to vector<8x8xf32>
    %72 = vector.shape_cast %71 : vector<8x8xf32> to vector<1x8x8xf32>
    %73 = vector.extract_strided_slice %68 {offsets = [0, 16], sizes = [8, 8], strides = [1, 1]} : vector<8x32xf32> to vector<8x8xf32>
    %74 = vector.shape_cast %73 : vector<8x8xf32> to vector<1x8x8xf32>
    %75 = vector.extract_strided_slice %68 {offsets = [0, 24], sizes = [8, 8], strides = [1, 1]} : vector<8x32xf32> to vector<8x8xf32>
    %76 = vector.shape_cast %75 : vector<8x8xf32> to vector<1x8x8xf32>
    %77 = tpu.concatenate %61, %63, %65, %67, %70, %72, %74, %76 in 0 : vector<1x8x8xf32>, vector<1x8x8xf32>, vector<1x8x8xf32>, vector<1x8x8xf32>, vector<1x8x8xf32>, vector<1x8x8xf32>, vector<1x8x8xf32>, vector<1x8x8xf32> -> vector<8x8x8xf32>
    %cst_22 = arith.constant dense<0.000000e+00> : vector<8x8x8xf32>
    %78 = tpu.matmul %39, %58, %cst_22 {dimension_numbers = #tpu.dot_dimension_numbers<[2], [2], [1], [1], [0, 0, 0, 1, 1, 1], [0], [0]>} : vector<8x8x8xf32>, vector<8x8x8xf32>, vector<8x8x8xf32> -> vector<8x8x8xf32>
    %cst_23 = arith.constant 0.353553385 : f32
    %79 = vector.broadcast %cst_23 : f32 to vector<8x8x8xf32>
    %80 = arith.mulf %78, %79 : vector<8x8x8xf32>
    %cst_24 = arith.constant dense<0xFF800000> : vector<8x8xf32>
    %81 = vector.multi_reduction <maximumf>, %80, %cst_24 [2] : vector<8x8x8xf32> to vector<8x8xf32>
    %82 = vector.shape_cast %81 : vector<8x8xf32> to vector<8x8x1xf32>
    %83 = vector.broadcast %82 : vector<8x8x1xf32> to vector<8x8x8xf32>
    %84 = arith.subf %80, %83 : vector<8x8x8xf32>
    %85 = math.exp %84 : vector<8x8x8xf32>
    %cst_25 = arith.constant dense<0.000000e+00> : vector<8x8xf32>
    %86 = vector.multi_reduction <add>, %85, %cst_25 [2] : vector<8x8x8xf32> to vector<8x8xf32>
    %87 = vector.shape_cast %86 : vector<8x8xf32> to vector<8x8x1xf32>
    %88 = tpu.reciprocal %87 {approx = true} : vector<8x8x1xf32> -> vector<8x8x1xf32>
    %89 = vector.broadcast %88 : vector<8x8x1xf32> to vector<8x8x8xf32>
    %90 = arith.mulf %85, %89 : vector<8x8x8xf32>
    %91 = vector.shape_cast %90 : vector<8x8x8xf32> to vector<2x32x8xf32>
    %c0_26 = arith.constant 0 : index
    %c0_27 = arith.constant 0 : index
    %c0_28 = arith.constant 0 : index
    %92 = vector.load %arg13[%c0_26, %c0_27, %c0_28] : memref<2x32x8xf32, #tpu.memory_space<vmem>>, vector<2x32x8xf32>
    tpu.vector_store %arg13[%c0_26, %c0_27, %c0_28], %91 {strides = array<i32>} : memref<2x32x8xf32, #tpu.memory_space<vmem>>, vector<2x32x8xf32>,
    %cst_29 = arith.constant dense<0.000000e+00> : vector<8x8x8xf32>
    %93 = tpu.matmul %90, %77, %cst_29 {dimension_numbers = #tpu.dot_dimension_numbers<[2], [1], [1], [2], [0, 0, 0, 1, 1, 2], [0], [0]>} : vector<8x8x8xf32>, vector<8x8x8xf32>, vector<8x8x8xf32> -> vector<8x8x8xf32>
    %94 = vector.extract_strided_slice %93 {offsets = [0, 0, 0], sizes = [1, 8, 8], strides = [1, 1, 1]} : vector<8x8x8xf32> to vector<1x8x8xf32>
    %95 = vector.shape_cast %94 : vector<1x8x8xf32> to vector<8x8xf32>
    %c0_30 = arith.constant 0 : index
    %c0_31 = arith.constant 0 : index
    %96 = vector.load %arg14[%c0_30, %c0_31] : memref<16x32xf32, #tpu.memory_space<vmem>>, vector<8x8xf32>
    tpu.vector_store %arg14[%c0_30, %c0_31], %95 {strides = array<i32>} : memref<16x32xf32, #tpu.memory_space<vmem>>, vector<8x8xf32>,
    %97 = vector.extract_strided_slice %93 {offsets = [1, 0, 0], sizes = [1, 8, 8], strides = [1, 1, 1]} : vector<8x8x8xf32> to vector<1x8x8xf32>
    %98 = vector.shape_cast %97 : vector<1x8x8xf32> to vector<8x8xf32>
    %c0_32 = arith.constant 0 : index
    %c8 = arith.constant 8 : index
    %99 = vector.load %arg14[%c0_32, %c8] : memref<16x32xf32, #tpu.memory_space<vmem>>, vector<8x8xf32>
    tpu.vector_store %arg14[%c0_32, %c8], %98 {strides = array<i32>} : memref<16x32xf32, #tpu.memory_space<vmem>>, vector<8x8xf32>,
    %100 = vector.extract_strided_slice %93 {offsets = [2, 0, 0], sizes = [1, 8, 8], strides = [1, 1, 1]} : vector<8x8x8xf32> to vector<1x8x8xf32>
    %101 = vector.shape_cast %100 : vector<1x8x8xf32> to vector<8x8xf32>
    %c0_33 = arith.constant 0 : index
    %c16 = arith.constant 16 : index
    %102 = vector.load %arg14[%c0_33, %c16] : memref<16x32xf32, #tpu.memory_space<vmem>>, vector<8x8xf32>
    tpu.vector_store %arg14[%c0_33, %c16], %101 {strides = array<i32>} : memref<16x32xf32, #tpu.memory_space<vmem>>, vector<8x8xf32>,
    %103 = vector.extract_strided_slice %93 {offsets = [3, 0, 0], sizes = [1, 8, 8], strides = [1, 1, 1]} : vector<8x8x8xf32> to vector<1x8x8xf32>
    %104 = vector.shape_cast %103 : vector<1x8x8xf32> to vector<8x8xf32>
    %c0_34 = arith.constant 0 : index
    %c24 = arith.constant 24 : index
    %105 = vector.load %arg14[%c0_34, %c24] : memref<16x32xf32, #tpu.memory_space<vmem>>, vector<8x8xf32>
    tpu.vector_store %arg14[%c0_34, %c24], %104 {strides = array<i32>} : memref<16x32xf32, #tpu.memory_space<vmem>>, vector<8x8xf32>,
    %106 = vector.extract_strided_slice %93 {offsets = [4, 0, 0], sizes = [1, 8, 8], strides = [1, 1, 1]} : vector<8x8x8xf32> to vector<1x8x8xf32>
    %107 = vector.shape_cast %106 : vector<1x8x8xf32> to vector<8x8xf32>
    %c8_35 = arith.constant 8 : index
    %c0_36 = arith.constant 0 : index
    %108 = vector.load %arg14[%c8_35, %c0_36] : memref<16x32xf32, #tpu.memory_space<vmem>>, vector<8x8xf32>
    tpu.vector_store %arg14[%c8_35, %c0_36], %107 {strides = array<i32>} : memref<16x32xf32, #tpu.memory_space<vmem>>, vector<8x8xf32>,
    %109 = vector.extract_strided_slice %93 {offsets = [5, 0, 0], sizes = [1, 8, 8], strides = [1, 1, 1]} : vector<8x8x8xf32> to vector<1x8x8xf32>
    %110 = vector.shape_cast %109 : vector<1x8x8xf32> to vector<8x8xf32>
    %c8_37 = arith.constant 8 : index
    %c8_38 = arith.constant 8 : index
    %111 = vector.load %arg14[%c8_37, %c8_38] : memref<16x32xf32, #tpu.memory_space<vmem>>, vector<8x8xf32>
    tpu.vector_store %arg14[%c8_37, %c8_38], %110 {strides = array<i32>} : memref<16x32xf32, #tpu.memory_space<vmem>>, vector<8x8xf32>,
    %112 = vector.extract_strided_slice %93 {offsets = [6, 0, 0], sizes = [1, 8, 8], strides = [1, 1, 1]} : vector<8x8x8xf32> to vector<1x8x8xf32>
    %113 = vector.shape_cast %112 : vector<1x8x8xf32> to vector<8x8xf32>
    %c8_39 = arith.constant 8 : index
    %c16_40 = arith.constant 16 : index
    %114 = vector.load %arg14[%c8_39, %c16_40] : memref<16x32xf32, #tpu.memory_space<vmem>>, vector<8x8xf32>
    tpu.vector_store %arg14[%c8_39, %c16_40], %113 {strides = array<i32>} : memref<16x32xf32, #tpu.memory_space<vmem>>, vector<8x8xf32>,
    %115 = vector.extract_strided_slice %93 {offsets = [7, 0, 0], sizes = [1, 8, 8], strides = [1, 1, 1]} : vector<8x8x8xf32> to vector<1x8x8xf32>
    %116 = vector.shape_cast %115 : vector<1x8x8xf32> to vector<8x8xf32>
    %c8_41 = arith.constant 8 : index
    %c24_42 = arith.constant 24 : index
    %117 = vector.load %arg14[%c8_41, %c24_42] : memref<16x32xf32, #tpu.memory_space<vmem>>, vector<8x8xf32>
    tpu.vector_store %arg14[%c8_41, %c24_42], %116 {strides = array<i32>} : memref<16x32xf32, #tpu.memory_space<vmem>>, vector<8x8xf32>,
    %c0_43 = arith.constant 0 : index
    %c0_44 = arith.constant 0 : index
    %118 = vector.load %arg14[%c0_43, %c0_44] : memref<16x32xf32, #tpu.memory_space<vmem>>, vector<16x32xf32>
    %c0_45 = arith.constant 0 : index
    %c0_46 = arith.constant 0 : index
    %119 = vector.load %arg10[%c0_45, %c0_46] : memref<32x32xf32, #tpu.memory_space<vmem>>, vector<32x32xf32>
    %cst_47 = arith.constant dense<0.000000e+00> : vector<16x32xf32>
    %120 = tpu.matmul %118, %119, %cst_47 {dimension_numbers = #tpu.dot_dimension_numbers<[1], [0], [0], [1], [0, 0, 1, 1], [], []>} : vector<16x32xf32>, vector<32x32xf32>, vector<16x32xf32> -> vector<16x32xf32>
    %c0_48 = arith.constant 0 : index
    %c0_49 = arith.constant 0 : index
    %121 = vector.load %arg11[%c0_48, %c0_49] : memref<1x32xf32, #tpu.memory_space<vmem>>, vector<1x32xf32>
    %122 = vector.broadcast %121 : vector<1x32xf32> to vector<16x32xf32>
    %123 = arith.addf %120, %122 : vector<16x32xf32>
    %124 = vector.shape_cast %123 : vector<16x32xf32> to vector<2x8x32xf32>
    %c0_50 = arith.constant 0 : index
    %c0_51 = arith.constant 0 : index
    %c0_52 = arith.constant 0 : index
    %125 = vector.load %arg12[%c0_50, %c0_51, %c0_52] : memref<2x8x32xf32, #tpu.memory_space<vmem>>, vector<2x8x32xf32>
    tpu.vector_store %arg12[%c0_50, %c0_51, %c0_52], %124 {strides = array<i32>} : memref<2x8x32xf32, #tpu.memory_space<vmem>>, vector<2x8x32xf32>,
    return
  }
  func.func @transform_0(%arg0: i32) -> (i32, i32, i32) {
    %c0_i32 = arith.constant 0 : i32
    %c0_i32_0 = arith.constant 0 : i32
    %c0_i32_1 = arith.constant 0 : i32
    return %arg0, %c0_i32, %c0_i32_0 : i32, i32, i32
  }
  func.func @transform_1(%arg0: i32) -> (i32, i32, i32) {
    %c0_i32 = arith.constant 0 : i32
    %c0_i32_0 = arith.constant 0 : i32
    %c0_i32_1 = arith.constant 0 : i32
    return %arg0, %c0_i32, %c0_i32_0 : i32, i32, i32
  }
  func.func @transform_2(%arg0: i32) -> (i32, i32, i32) {
    %c0_i32 = arith.constant 0 : i32
    %c0_i32_0 = arith.constant 0 : i32
    %c0_i32_1 = arith.constant 0 : i32
    return %arg0, %c0_i32, %c0_i32_0 : i32, i32, i32
  }
  func.func @transform_3(%arg0: i32) -> (i32, i32) {
    %c0_i32 = arith.constant 0 : i32
    %c0_i32_0 = arith.constant 0 : i32
    %c0_i32_1 = arith.constant 0 : i32
    return %c0_i32, %c0_i32_0 : i32, i32
  }
  func.func @transform_4(%arg0: i32) -> (i32, i32) {
    %c0_i32 = arith.constant 0 : i32
    %c0_i32_0 = arith.constant 0 : i32
    %c0_i32_1 = arith.constant 0 : i32
    return %c0_i32, %c0_i32_0 : i32, i32
  }
  func.func @transform_5(%arg0: i32) -> (i32, i32) {
    %c0_i32 = arith.constant 0 : i32
    %c0_i32_0 = arith.constant 0 : i32
    %c0_i32_1 = arith.constant 0 : i32
    return %c0_i32, %c0_i32_0 : i32, i32
  }
  func.func @transform_6(%arg0: i32) -> (i32, i32) {
    %c0_i32 = arith.constant 0 : i32
    %c0_i32_0 = arith.constant 0 : i32
    %c0_i32_1 = arith.constant 0 : i32
    return %c0_i32, %c0_i32_0 : i32, i32
  }
  func.func @transform_7(%arg0: i32) -> (i32, i32) {
    %c0_i32 = arith.constant 0 : i32
    %c0_i32_0 = arith.constant 0 : i32
    %c0_i32_1 = arith.constant 0 : i32
    return %c0_i32, %c0_i32_0 : i32, i32
  }
  func.func @transform_8(%arg0: i32) -> (i32, i32) {
    %c0_i32 = arith.constant 0 : i32
    %c0_i32_0 = arith.constant 0 : i32
    %c0_i32_1 = arith.constant 0 : i32
    return %c0_i32, %c0_i32_0 : i32, i32
  }
  func.func @transform_9(%arg0: i32) -> (i32, i32) {
    %c0_i32 = arith.constant 0 : i32
    %c0_i32_0 = arith.constant 0 : i32
    %c0_i32_1 = arith.constant 0 : i32
    return %c0_i32, %c0_i32_0 : i32, i32
  }
  func.func @transform_10(%arg0: i32) -> (i32, i32) {
    %c0_i32 = arith.constant 0 : i32
    %c0_i32_0 = arith.constant 0 : i32
    %c0_i32_1 = arith.constant 0 : i32
    return %c0_i32, %c0_i32_0 : i32, i32
  }
  func.func @transform_11(%arg0: i32) -> (i32, i32, i32) {
    %c0_i32 = arith.constant 0 : i32
    %c0_i32_0 = arith.constant 0 : i32
    %c0_i32_1 = arith.constant 0 : i32
    return %arg0, %c0_i32, %c0_i32_0 : i32, i32, i32
  }
  func.func @transform_12(%arg0: i32) -> (i32, i32, i32) {
    %c0_i32 = arith.constant 0 : i32
    %c0_i32_0 = arith.constant 0 : i32
    %c0_i32_1 = arith.constant 0 : i32
    return %arg0, %c0_i32, %c0_i32_0 : i32, i32, i32
  }
}

</mosaic_0001>

<bundles_post_ra>
// kernel: tpu_custom_call.1
= control target key start
LH: loop header
LB: loop body
LE: loop exit
PB: predicated region body
PF: predicated region fallthrough
CT: control target
= control target key end

     0   :  { %18 = vsyncpa [#allocation4], 0  ;;  %s2791_s0 = inlined_call_operand.hbm [shape: f32[2,8,32], index: 0, kind: input, shape index: {}]   ;;  %s2792_s1 = inlined_call_operand.hbm [shape: f32[2,8,32], index: 1, kind: input, shape index: {}]   ;;  %s2793_s2 = inlined_call_operand.hbm [shape: f32[2,8,32], index: 2, kind: input, shape index: {}]   ;;  %s2794_s3 = inlined_call_operand.hbm [shape: f32[32,32], index: 3, kind: input, shape index: {}]   ;;  %s2795_s4 = inlined_call_operand.vmem [shape: f32[1,32], index: 4, kind: input, shape index: {}]   ;;  %s2796_s5 = inlined_call_operand.hbm [shape: f32[32,32], index: 5, kind: input, shape index: {}]   ;;  %s2797_s6 = inlined_call_operand.vmem [shape: f32[1,32], index: 6, kind: input, shape index: {}]   ;;  %s2798_s7 = inlined_call_operand.hbm [shape: f32[32,32], index: 7, kind: input, shape index: {}]   ;;  %s2799_s8 = inlined_call_operand.hbm [shape: f32[1,32], index: 8, kind: input, shape index: {}]   ;;  %s2800_s9 = inlined_call_operand.vmem [shape: f32[32,32], index: 9, kind: input, shape index: {}]   ;;  %s2801_s10 = inlined_call_operand.vmem [shape: f32[1,32], index: 10, kind: input, shape index: {}]   ;;  %s2802_s11 = inlined_call_operand.hbm [shape: f32[2,8,32], index: 11, kind: output, shape index: {0}]   ;;  %s2803_s12 = inlined_call_operand.vmem [shape: f32[2,32,8], index: 12, kind: output, shape index: {1}]  }
   0x1   :  { %19 = vsyncpa [#allocation7], 0 }
   0x2   :  { %20 = vsyncpa [#allocation10], 0 }
   0x3   :  { %21 = vsyncpa [#allocation13], 0 }
   0x4   :  { %22 = vsyncpa [#allocation5], 0  ;;  %s2384_s21 = smov [#allocation6]   ;;  %s2385_s23 = smov [#allocation9]  }
   0x5   :  { %s40_s22 = sshll.u32 %s2384_s21, 4  ;;  %s64_s24 = sshll.u32 %s2385_s23, 4  ;;  %s41_s22 = int_to_ptr.vmem [resolvable:$true] %s40_s22  ;;  %s2466_s24 = int_to_ptr.vmem [resolvable:$true] %s64_s24 }
   0x6   :  { %s2198_s27 = scalar_lea.hbm %s2792_s1, 256 }
   0x7   :  { %p2199_p0 = scmp.ne.s32.totalorder %s2792_s1, %s2198_s27  ;;  %p2202_p1 = scmp.lt.u32.totalorder %s2198_s27, %s2792_s1 }
   0x9   :  { %p2204_p2 = pnand %p2202_p1, %p2199_p0 }
   0xb   :  { %2207 = shalt.err (!%p2204_p2)
}
   0xc   :  { %s2208_s14 = scalar_lea.vmem %s41_s22, 256  ;;  %p2213_p4 = scmp.lt.s32.totalorder %s41_s22, %s41_s22 }
   0xd   :  { %p2209_p3 = scmp.ne.s32.totalorder %s41_s22, %s2208_s14  ;;  %p2214_p5 = scmp.lt.s32.totalorder %s2208_s14, %s2208_s14 }
   0xf   :  { %p2215_p6 = por %p2214_p5, %p2213_p4 }
  0x11   :  { %p2216_p7 = pnand %p2215_p6, %p2209_p3 }
  0x13   :  { %2219 = shalt.err (!%p2216_p7)
}
  0x14   :  { %s2386_s15 = smov 128   ;;  %s2387_s16 = smov 8  }
  0x15   :  { %46 = dma.hbm_to_vmem [thread:$0]  %s2792_s1, 256, %s41_s22, [#allocation7], %s2386_s15, %s2386_s15, %s2387_s16  }
  0x16   :  { %s2220_s21 = scalar_lea.hbm %s2794_s3, 512 }
  0x17   :  { %p2221_p8 = scmp.ne.s32.totalorder %s2794_s3, %s2220_s21  ;;  %p2224_p9 = scmp.lt.u32.totalorder %s2220_s21, %s2794_s3 }
  0x19   :  { %p2226_p10 = pnand %p2224_p9, %p2221_p8 }
  0x1b   :  { %2229 = shalt.err (!%p2226_p10)
}
  0x1c   :  { %s2230_s28 = scalar_lea.vmem %s2466_s24, 512  ;;  %p2235_p12 = scmp.lt.s32.totalorder %s2466_s24, %s2466_s24 }
  0x1d   :  { %p2231_p11 = scmp.ne.s32.totalorder %s2466_s24, %s2230_s28  ;;  %p2236_p13 = scmp.lt.s32.totalorder %s2230_s28, %s2230_s28 }
  0x1f   :  { %p2237_p0 = por %p2236_p13, %p2235_p12 }
  0x21   :  { %p2238_p1 = pnand %p2237_p0, %p2231_p11 }
  0x23   :  { %2241 = shalt.err (!%p2238_p1)
}
  0x24   :  { %70 = dma.hbm_to_vmem [thread:$0]  %s2794_s3, 512, %s2466_s24, [#allocation10], %s2386_s15, %s2386_s15, %s2387_s16  }
  0x25   :  { %s2388_s29 = smov [#allocation12]   ;;  %s2389_s13 = smov [#allocation3]  }
  0x26   :  { %s92_s30 = sshll.u32 %s2388_s29, 4  ;;  %s28_s14 = sshll.u32 %s2389_s13, 4  ;;  %s93_s30 = int_to_ptr.vmem [resolvable:$true] %s92_s30  ;;  %s2503_s14 = int_to_ptr.vmem [resolvable:$true] %s28_s14 }
  0x27   :  { %s2242_s19 = scalar_lea.hbm %s2798_s7, 512 }
  0x28   :  { %p2243_p2 = scmp.ne.s32.totalorder %s2798_s7, %s2242_s19  ;;  %p2246_p3 = scmp.lt.u32.totalorder %s2242_s19, %s2798_s7 }
  0x2a   :  { %p2248_p4 = pnand %p2246_p3, %p2243_p2 }
  0x2c   :  { %2251 = shalt.err (!%p2248_p4)
}
  0x2d   :  { %s2252_s3 = scalar_lea.vmem %s93_s30, 512  ;;  %p2257_p6 = scmp.lt.s32.totalorder %s93_s30, %s93_s30 }
  0x2e   :  { %p2253_p5 = scmp.ne.s32.totalorder %s93_s30, %s2252_s3  ;;  %p2258_p7 = scmp.lt.s32.totalorder %s2252_s3, %s2252_s3 }
  0x30   :  { %p2259_p8 = por %p2258_p7, %p2257_p6 }
  0x32   :  { %p2260_p9 = pnand %p2259_p8, %p2253_p5 }
  0x34   :  { %2263 = shalt.err (!%p2260_p9)
}
  0x35   :  { %98 = dma.hbm_to_vmem [thread:$0]  %s2798_s7, 512, %s93_s30, [#allocation13], %s2386_s15, %s2386_s15, %s2387_s16  }
  0x36   :  { %s2264_s1 = scalar_lea.hbm %s2791_s0, 256 }
  0x37   :  { %p2265_p10 = scmp.ne.s32.totalorder %s2791_s0, %s2264_s1  ;;  %p2268_p11 = scmp.lt.u32.totalorder %s2264_s1, %s2791_s0 }
  0x39   :  { %p2270_p12 = pnand %p2268_p11, %p2265_p10 }
  0x3b   :  { %2273 = shalt.err (!%p2270_p12)
}
  0x3c   :  { %s2274_s18 = scalar_lea.vmem %s2503_s14, 256  ;;  %p2279_p0 = scmp.lt.s32.totalorder %s2503_s14, %s2503_s14 }
  0x3d   :  { %p2275_p13 = scmp.ne.s32.totalorder %s2503_s14, %s2274_s18  ;;  %p2280_p1 = scmp.lt.s32.totalorder %s2274_s18, %s2274_s18 }
  0x3f   :  { %p2281_p2 = por %p2280_p1, %p2279_p0 }
  0x41   :  { %p2282_p3 = pnand %p2281_p2, %p2275_p13 }
  0x43   :  { %2285 = shalt.err (!%p2282_p3)
}
  0x44   :  { %34 = dma.hbm_to_vmem [thread:$0]  %s2791_s0, 256, %s2503_s14, [#allocation4], %s2386_s15, %s2386_s15, %s2387_s16  }
  0x45   :  { %s2390_s19 = smov [#allocation8]   ;;  %s2391_s21 = smov [#allocation11]  }
  0x46   :  { %s52_s20 = sshll.u32 %s2390_s19, 4  ;;  %s78_s23 = sshll.u32 %s2391_s21, 4  ;;  %s53_s20 = int_to_ptr.vmem [resolvable:$true] %s52_s20  ;;  %s2540_s23 = int_to_ptr.vmem [resolvable:$true] %s78_s23 }
  0x47   :  { %s2286_s24 = scalar_lea.hbm %s2793_s2, 256 }
  0x48   :  { %p2287_p4 = scmp.ne.s32.totalorder %s2793_s2, %s2286_s24  ;;  %p2290_p5 = scmp.lt.u32.totalorder %s2286_s24, %s2793_s2 }
  0x4a   :  { %p2292_p6 = pnand %p2290_p5, %p2287_p4 }
  0x4c   :  { %2295 = shalt.err (!%p2292_p6)
}
  0x4d   :  { %s2296_s0 = scalar_lea.vmem %s53_s20, 256  ;;  %p2301_p8 = scmp.lt.s32.totalorder %s53_s20, %s53_s20 }
  0x4e   :  { %p2297_p7 = scmp.ne.s32.totalorder %s53_s20, %s2296_s0  ;;  %p2302_p9 = scmp.lt.s32.totalorder %s2296_s0, %s2296_s0 }
  0x50   :  { %p2303_p10 = por %p2302_p9, %p2301_p8 }
  0x52   :  { %p2304_p11 = pnand %p2303_p10, %p2297_p7 }
  0x54   :  { %2307 = shalt.err (!%p2304_p11)
}
  0x55   :  { %58 = dma.hbm_to_vmem [thread:$0]  %s2793_s2, 256, %s53_s20, [#allocation7], %s2386_s15, %s2386_s15, %s2387_s16  }
  0x56   :  { %s2308_s17 = scalar_lea.hbm %s2796_s5, 512 }
  0x57   :  { %p2309_p12 = scmp.ne.s32.totalorder %s2796_s5, %s2308_s17  ;;  %p2312_p13 = scmp.lt.u32.totalorder %s2308_s17, %s2796_s5 }
  0x59   :  { %p2314_p0 = pnand %p2312_p13, %p2309_p12 }
  0x5b   :  { %2317 = shalt.err (!%p2314_p0)
}
  0x5c   :  { %s2318_s21 = scalar_lea.vmem %s2540_s23, 512  ;;  %p2323_p2 = scmp.lt.s32.totalorder %s2540_s23, %s2540_s23 }
  0x5d   :  { %p2319_p1 = scmp.ne.s32.totalorder %s2540_s23, %s2318_s21  ;;  %p2324_p3 = scmp.lt.s32.totalorder %s2318_s21, %s2318_s21 }
  0x5f   :  { %p2325_p4 = por %p2324_p3, %p2323_p2 }
  0x61   :  { %p2326_p5 = pnand %p2325_p4, %p2319_p1 }
  0x63   :  { %2329 = shalt.err (!%p2326_p5)
}
  0x64   :  { %84 = dma.hbm_to_vmem [thread:$0]  %s2796_s5, 512, %s2540_s23, [#allocation10], %s2386_s15, %s2386_s15, %s2387_s16  }
  0x65   :  { %s2392_s25 = smov [#allocation14]   ;;  %s2330_s27 = scalar_lea.hbm %s2799_s8, 16 }
  0x66   :  { %s105_s3 = sshll.u32 %s2392_s25, 4  ;;  %p2331_p6 = scmp.ne.s32.totalorder %s2799_s8, %s2330_s27  ;;  %s106_s3 = int_to_ptr.vmem [resolvable:$true] %s105_s3 }
  0x67   :  { %p2334_p7 = scmp.lt.u32.totalorder %s2330_s27, %s2799_s8 }
  0x69   :  { %p2336_p8 = pnand %p2334_p7, %p2331_p6 }
  0x6b   :  { %2339 = shalt.err (!%p2336_p8)
}
  0x6c   :  { %s2340_s22 = scalar_lea.vmem %s106_s3, 16  ;;  %s2344_s5 = scalar_lea.vmem %s106_s3, 32 }
  0x6d   :  { %p2341_p9 = scmp.ne.s32.totalorder %s106_s3, %s2340_s22  ;;  %p2345_p10 = scmp.lt.s32.totalorder %s106_s3, %s106_s3 }
  0x6e   :  { %p2346_p11 = scmp.lt.s32.totalorder %s2344_s5, %s2340_s22 }
  0x70   :  { %p2347_p12 = por %p2346_p11, %p2345_p10 }
  0x72   :  { %p2348_p13 = pnand %p2347_p12, %p2341_p9 }
  0x74   :  { %2351 = shalt.err (!%p2348_p13)
}
  0x75   :  { %108 = dma.hbm_to_vmem [thread:$0]  %s2799_s8, 16, %s106_s3, [#allocation13]  }
  0x76   :  { %2374 = dma.done.wait [#allocation4], 256  }
  0x77   :  { %2375 = vsyncadd [#allocation4], 4294967040 }
  0x78   :  { %2376 = dma.done.wait [#allocation7], 512  }
  0x79   :  { %2377 = vsyncadd [#allocation7], 4294966784 }
  0x7a   :  { %2378 = dma.done.wait [#allocation10], 1024  }
  0x7b   :  { %2379 = vsyncadd [#allocation10], 4294966272 }
  0x7c   :  { %2380 = dma.done.wait [#allocation13], 528  }
  0x7d   :  { %2381 = vsyncadd [#allocation13], 4294966768  ;;  %v233_v0 = vld [vmem:[#allocation11] sm:$0xff]  ;;  %v234_v1 = vld [vmem:[#allocation11 + $0x8] sm:$0xff]  ;;  %vm151_vm0 = vcmask 261120   ;;  %v2393_v24 = vmov 0.0  }
  0x7e   :  { %v140_v2 = vld [vmem:[#allocation9] sm:$0xff]  ;;  %v2125_v3 = vpack.c.bf16 %v234_v1, %v233_v0  ;;  %v141_v4 = vld [vmem:[#allocation9 + $0x8] sm:$0xff]  ;;  %v235_v5 = vld [vmem:[#allocation11 + $0x10] sm:$0xff]  ;;  %vm2394_vm1 = vmmov 0   ;;  %vm465_vm2 = vcmask 64512   ;;  %s2395_s7 = smov 112  }
  0x7f   :  { %v236_v6 = vld [vmem:[#allocation11 + $0x18] sm:$0xff]  ;;  %v2117_v7 = vpack.c.bf16 %v141_v4, %v140_v2  ;;  %v142_v9 = vld [vmem:[#allocation9 + $0x10] sm:$0xff]  ;;  %v136_v11 = vld [vmem:[#allocation6] sm:$0xff]  ;;  %s2396_s30 = smov 120   ;;  %vm1751_vm3 = vcmask 130112   ;;  %vm1757_vm4 = vcmask 195712  }
  0x80   :  { %v2129_v8 = vpack.c.bf16 %v236_v6, %v235_v5  ;;  %v143_v10 = vld [vmem:[#allocation9 + $0x18] sm:$0xff]  ;;  %2126 = vmatprep.subr.bf16.mxu1 %v2125_v3  ;;  %2012 = vmatprep.mubr.msk.f32.mxu1 %vm151_vm0, %v136_v11  ;;  %v134_v13 = vld [vmem:[#allocation3] sm:$0xff]  ;;  %v325_v14 = vld [vmem:[#allocation12] sm:$0xff]  ;;  %vm1763_vm5 = vcmask 261312   ;;  %s2400_s19 = smov [#allocation15]  }
  0x81   :  { %v2121_v12 = vpack.c.bf16 %v143_v10, %v142_v9  ;;  %2128 = vmatpush3.bf16.msra.mxu1 %v2125_v3  ;;  %2118 = vmatprep.subr.bf16.mxu0 %v2117_v7  ;;  %v326_v15 = vld [vmem:[#allocation12 + $0x8] sm:$0xff]  ;;  %v327_v17 = vld [vmem:[#allocation12 + $0x10] sm:$0xff]  ;;  %v328_v18 = vld [vmem:[#allocation12 + $0x18] sm:$0xff]  ;;  %s1882_s21 = sshll.u32 %s2400_s19, 4  ;;  %s1883_s21 = int_to_ptr.vmem [resolvable:$true] %s1882_s21 }
  0x82   :  { %2120 = vmatpush3.bf16.msra.mxu0 %v2117_v7  ;;  %2130 = vmatprep.subr.bf16.mxu1 %v2129_v8  ;;  %v2133_v16 = vpack.c.bf16 %v326_v15, %v325_v14  ;;  %v137_v19 = vld [vmem:[#allocation6 + $0x8] sm:$0xff]  ;;  %v135_v20 = vld [vmem:[#allocation3 + $0x8] sm:$0xff]  ;;  %v2137_v21 = vpack.c.bf16 %v328_v18, %v327_v17  ;;  %v138_v22 = vld [vmem:[#allocation8] sm:$0xff]  ;;  %s2352_s2 = scalar_lea.vmem %s1883_s21, 256  ;;  %p2357_p1 = scmp.lt.s32.totalorder %s1883_s21, %s1883_s21 }
  0x83   :  { %2122 = vmatprep.subr.bf16.mxu0 %v2121_v12  ;;  %2001 = vmatprep.mubr.msk.f32.mxu0 %vm151_vm0, %v134_v13  ;;  %v139_v23 = vld [vmem:[#allocation8 + $0x8] sm:$0xff]  ;;  %v1904_v25 = vld [vmem:[%s2797_s6] ss:$0 sm:$0xff]  ;;  %p2353_p0 = scmp.ne.s32.totalorder %s1883_s21, %s2352_s2  ;;  %p2358_p2 = scmp.lt.s32.totalorder %s2352_s2, %s2352_s2 }
  0x84   :  { %v1901_v26 = vld [vmem:[%s2795_s4] ss:$0 sm:$0xff]  ;;  %s2397_s4 = smov 104  }
  0x85   :  { %2132 = vmatpush3.bf16.msra.mxu1 %v2129_v8  ;;  %v1907_v35 = vld [vmem:[#allocation14] ss:$0 sm:$0xff]  ;;  %p2359_p3 = por %p2358_p2, %p2357_p1 }
  0x86   :  { %2124 = vmatpush3.bf16.msra.mxu0 %v2121_v12  ;;  %2026 = vmatprep.subr.mxu1 %v2393_v24 }
  0x87   :  { %2134 = vmatprep.subr.bf16.mxu0 %v2133_v16  ;;  %p2360_p4 = pnand %p2359_p3, %p2353_p0 }
  0x88   :  { %2013 = vmatmul.mubr.msk.f32.vlgmr.msra.gmra.mrb[0].mxu1 %vm151_vm0, %v137_v19 }
  0x89   :  { %2002 = vmatmul.mubr.msk.f32.vlgmr.msra.gmra.mrb[0].mxu0 %vm151_vm0, %v135_v20  ;;  %2028 = vmatprep.mubr.msk.f32.mxu1 %vm2394_vm1, %v2393_v24 }
  0x8a   :  { %2136 = vmatpush3.bf16.msra.mxu0 %v2133_v16  ;;  %2023 = vmatprep.mubr.msk.f32.mxu0 %vm151_vm0, %v138_v22 }
  0x8b   :  { %2138 = vmatprep.subr.bf16.mxu0 %v2137_v21 }
  0x8e   :  { %2140 = vmatpush3.bf16.msra.mxu0 %v2137_v21 }
  0x8f   :  { %2046 = vmatprep.subr.mxu0 %v2393_v24 }
  0x91   :  { %2024 = vmatmul.mubr.msk.f32.vlgmr.msra.gmra.mrb[2].mxu0 %vm151_vm0, %v139_v23 }
  0x92   :  { %2048 = vmatprep.mubr.msk.f32.mxu0 %vm2394_vm1, %v2393_v24 }
 0x15b   :  { %v2014_v27 = vpop.f32.mrb[0].mxu1 }
 0x15c   :  { %v322_v28 = vadd.f32 %v2014_v27, %v1904_v25  ;;  %v316_v29 = vpop.f32.mrb[1].mxu1  ;;  %v2003_v30 = vpop.f32.mrb[0].mxu0 }
 0x15d   :  { %v317_v31 = vadd.f32 %v1904_v25, %v316_v29  ;;  %v230_v32 = vadd.f32 %v2003_v30, %v1901_v26  ;;  %v224_v33 = vpop.f32.mrb[1].mxu0 }
 0x15e   :  { %2047 = vmatpush3.xpose.msk.msra.mxu0 %vm465_vm2, %v322_v28  ;;  %v225_v34 = vadd.f32 %v1901_v26, %v224_v33 }
 0x15f   :  { %434 = vrot.lane.b32.xlu1 %v317_v31, %s2395_s7  ;;  %432 = vrot.lane.b32.xlu0 %v317_v31, %s2396_s30 }
 0x160   :  { %2027 = vmatpush3.xpose.msk.msra.mxu1 %vm465_vm2, %v317_v31  ;;  %2056 = vmatprep.subr.mxu0 %v2393_v24 }
 0x161   :  { %2049 = vmatmul.mubr.msk.f32.vlgmr.msra.gmra.mrb[4].mxu0 %vm465_vm2, %v230_v32  ;;  %2031 = vmatprep.subr.mxu1 %v2393_v24 }
 0x162   :  { %2058 = vmatprep.mubr.msk.f32.mxu0 %vm2394_vm1, %v2393_v24 }
 0x163   :  { %2029 = vmatmul.mubr.msk.f32.vlgmr.msra.gmra.mrb[2].mxu1 %vm465_vm2, %v225_v34  ;;  %420 = vrot.lane.b32.xlu1 %v225_v34, %s2395_s7 }
 0x164   :  { %418 = vrot.lane.b32.xlu0 %v225_v34, %s2396_s30  ;;  %2033 = vmatprep.mubr.msk.f32.mxu1 %vm2394_vm1, %v2393_v24  ;;  %v2025_v36 = vpop.f32.mrb[2].mxu0 }
 0x165   :  { %v2629_v37 = vadd.f32 %v2025_v36, %v1907_v35  ;;  %v408_v38 = vpop.f32.mrb[3].mxu0 }
 0x166   :  { %v409_v49 = vadd.f32 %v1907_v35, %v408_v38 }
 0x167   :  { %425 = vrot.lane.b32.xlu1 %v230_v32, %s2396_s30 }
 0x168   :  { %436 = vrot.lane.b32.xlu0 %v317_v31, %s2397_s4 }
 0x16b   :  { %422 = vrot.lane.b32.xlu1 %v225_v34, %s2397_s4 }
 0x16c   :  { %439 = vrot.lane.b32.xlu0 %v322_v28, %s2396_s30 }
 0x16f   :  { %443 = vrot.lane.b32.xlu1 %v322_v28, %s2397_s4 }
 0x170   :  { %441 = vrot.lane.b32.xlu0 %v322_v28, %s2395_s7 }
 0x173   :  { %429 = vrot.lane.b32.xlu1 %v230_v32, %s2397_s4 }
 0x174   :  { %427 = vrot.lane.b32.xlu0 %v230_v32, %s2395_s7 }
 0x1d1   :  { %v435_v39 = vpop.permute.xlu1 %434  ;;  %v433_v40 = vpop.permute.xlu0 %432 }
 0x1d2   :  { %2032 = vmatpush3.xpose.msk.msra.mxu1 %vm465_vm2, %v433_v40 }
 0x1d3   :  { %2036 = vmatprep.subr.mxu1 %v2393_v24 }
 0x1d5   :  { %v421_v41 = vpop.permute.xlu1 %420 }
 0x1d6   :  { %v419_v42 = vpop.permute.xlu0 %418 }
 0x1d7   :  { %2034 = vmatmul.mubr.msk.f32.vlgmr.msra.gmra.mrb[4].mxu1 %vm465_vm2, %v419_v42 }
 0x1d8   :  { %2037 = vmatpush3.xpose.msk.msra.mxu1 %vm465_vm2, %v435_v39  ;;  %2038 = vmatprep.mubr.msk.f32.mxu1 %vm2394_vm1, %v2393_v24 }
 0x1d9   :  { %v426_v43 = vpop.permute.xlu1 %425  ;;  %2041 = vmatprep.subr.mxu1 %v2393_v24 }
 0x1da   :  { %v437_v44 = vpop.permute.xlu0 %436 }
 0x1db   :  { %2039 = vmatmul.mubr.msk.f32.vlgmr.msra.gmra.mrb[6].mxu1 %vm465_vm2, %v421_v41 }
 0x1dc   :  { %2042 = vmatpush3.xpose.msk.msra.mxu1 %vm465_vm2, %v437_v44  ;;  %2043 = vmatprep.mubr.msk.f32.mxu1 %vm2394_vm1, %v2393_v24 }
 0x1dd   :  { %v423_v45 = vpop.permute.xlu1 %422  ;;  %2051 = vmatprep.subr.mxu1 %v2393_v24 }
 0x1de   :  { %v440_v46 = vpop.permute.xlu0 %439 }
 0x1df   :  { %2044 = vmatmul.mubr.msk.f32.vlgmr.msra.gmra.mrb[8].mxu1 %vm465_vm2, %v423_v45 }
 0x1e0   :  { %2052 = vmatpush3.xpose.msk.msra.mxu1 %vm465_vm2, %v440_v46  ;;  %2053 = vmatprep.mubr.msk.f32.mxu1 %vm2394_vm1, %v2393_v24 }
 0x1e1   :  { %v444_v47 = vpop.permute.xlu1 %443  ;;  %2061 = vmatprep.subr.mxu1 %v2393_v24 }
 0x1e2   :  { %v442_v48 = vpop.permute.xlu0 %441 }
 0x1e3   :  { %2054 = vmatmul.mubr.msk.f32.vlgmr.msra.gmra.mrb[10].mxu1 %vm465_vm2, %v426_v43  ;;  %2057 = vmatpush3.xpose.msk.msra.mxu0 %vm465_vm2, %v442_v48 }
 0x1e4   :  { %2062 = vmatpush3.xpose.msk.msra.mxu1 %vm465_vm2, %v444_v47  ;;  %2063 = vmatprep.mubr.msk.f32.mxu1 %vm2394_vm1, %v2393_v24 }
 0x1e5   :  { %v430_v50 = vpop.permute.xlu1 %429  ;;  %2066 = vmatprep.subr.mxu0 %v2393_v24  ;;  %2071 = vmatprep.subr.mxu1 %v2393_v24 }
 0x1e6   :  { %v428_v51 = vpop.permute.xlu0 %427 }
 0x1e7   :  { %2059 = vmatmul.mubr.msk.f32.vlgmr.msra.gmra.mrb[6].mxu0 %vm465_vm2, %v428_v51  ;;  %2064 = vmatmul.mubr.msk.f32.vlgmr.msra.gmra.mrb[12].mxu1 %vm465_vm2, %v430_v50 }
 0x1e8   :  { %2067 = vmatpush3.msra.mxu0 %v409_v49  ;;  %2073 = vmatprep.mubr.msk.f32.mxu1 %vm2394_vm1, %v2393_v24 }
 0x1e9   :  { %2068 = vmatprep.mubr.msk.f32.mxu0 %vm2394_vm1, %v2393_v24  ;;  %2076 = vmatprep.subr.mxu0 %v2393_v24 }
 0x234   :  { %v832_v52 = vpop.f32.mrb[4].mxu0 }
 0x235   :  { %v2050_v53 = vpop.f32.mrb[5].mxu0  ;;  %v1062_v61 = vmul.f32 0.35355338, %v832_v52 }
 0x236   :  { %v536_v54 = vpop.f32.mrb[2].mxu1 }
 0x237   :  { %v1058_v55 = vmul.f32 0.35355338, %v536_v54  ;;  %v2030_v56 = vpop.f32.mrb[3].mxu1  ;;  %v1078_v2 = vsel %vm465_vm2, %v1062_v61, -inf }
 0x239   :  { %v1066_v57 = vsel %vm465_vm2, %v1058_v55, -inf }
 0x23a   :  { %1067 = vmax.xlane.f32.xlu0 %v1066_v57 }
 0x2aa   :  { %v610_v58 = vpop.f32.mrb[4].mxu1 }
 0x2ab   :  { %v1059_v59 = vmul.f32 0.35355338, %v610_v58  ;;  %v2035_v60 = vpop.f32.mrb[5].mxu1 }
 0x2ad   :  { %v1069_v62 = vsel %vm465_vm2, %v1059_v59, -inf }
 0x2ae   :  { %1070 = vmax.xlane.f32.xlu1 %v1069_v62  ;;  %v684_v63 = vpop.f32.mrb[6].mxu1 }
 0x2af   :  { %v1060_v0 = vmul.f32 0.35355338, %v684_v63  ;;  %v2040_v1 = vpop.f32.mrb[7].mxu1 }
 0x2b1   :  { %v1072_v3 = vsel %vm465_vm2, %v1060_v0, -inf }
 0x2b2   :  { %1079 = vmax.xlane.f32.xlu1 %v1078_v2  ;;  %1073 = vmax.xlane.f32.xlu0 %v1072_v3  ;;  %v758_v4 = vpop.f32.mrb[8].mxu1 }
 0x2b3   :  { %v1061_v5 = vmul.f32 0.35355338, %v758_v4  ;;  %v2045_v6 = vpop.f32.mrb[9].mxu1 }
 0x2b5   :  { %v1075_v7 = vsel %vm465_vm2, %v1061_v5, -inf }
 0x2b6   :  { %1076 = vmax.xlane.f32.xlu0 %v1075_v7  ;;  %v906_v8 = vpop.f32.mrb[10].mxu1 }
 0x2b7   :  { %v1063_v9 = vmul.f32 0.35355338, %v906_v8  ;;  %v2055_v10 = vpop.f32.mrb[11].mxu1 }
 0x2b9   :  { %v1081_v11 = vsel %vm465_vm2, %v1063_v9, -inf }
 0x2ba   :  { %v980_v12 = vpop.f32.mrb[6].mxu0  ;;  %1082 = vmax.xlane.f32.xlu0 %v1081_v11  ;;  %v1054_v13 = vpop.f32.mrb[12].mxu1 }
 0x2bb   :  { %v1064_v14 = vmul.f32 0.35355338, %v980_v12  ;;  %v1065_v15 = vmul.f32 0.35355338, %v1054_v13  ;;  %v2060_v16 = vpop.f32.mrb[7].mxu0  ;;  %v2065_v17 = vpop.f32.mrb[13].mxu1 }
 0x2bd   :  { %v1084_v18 = vsel %vm465_vm2, %v1064_v14, -inf  ;;  %v1087_v19 = vsel %vm465_vm2, %v1065_v15, -inf }
 0x2be   :  { %1085 = vmax.xlane.f32.xlu1 %v1084_v18  ;;  %1088 = vmax.xlane.f32.xlu0 %v1087_v19 }
 0x2c7   :  { %v1068_v20 = vpop.xlane.xlu0 %1067 }
 0x2c8   :  { %v1090_v23 = vsub.f32 %v1058_v55, %v1068_v20 }
 0x2ca   :  { %v1098_v29 = vmul.f32 1.442695, %v1090_v23 }
 0x2cf   :  { %446 = vrot.lane.b32.xlu1 %v409_v49, %s2396_s30 }
 0x2d3   :  { %452 = vrot.lane.b32.xlu1 %v409_v49, %s2397_s4 }
 0x2d4   :  { %449 = vrot.lane.b32.xlu0 %v409_v49, %s2395_s7 }
 0x2d7   :  { %456 = vrot.lane.b32.xlu1 %v2629_v37, %s2396_s30  ;;  %s2398_s30 = smov 16  }
 0x33b   :  { %v1071_v21 = vpop.xlane.xlu1 %1070 }
 0x33c   :  { %v1091_v22 = vsub.f32 %v1059_v59, %v1071_v21 }
 0x33e   :  { %v1100_v25 = vmul.f32 1.442695, %v1091_v22 }
 0x33f   :  { %v1080_v26 = vpop.xlane.xlu1 %1079  ;;  %v1074_v27 = vpop.xlane.xlu0 %1073 }
 0x340   :  { %2166 = vpow2.f32 %v1100_v25  ;;  %v1094_v28 = vsub.f32 %v1062_v61, %v1080_v26  ;;  %v1092_v38 = vsub.f32 %v1060_v0, %v1074_v27 }
 0x342   :  { %v1106_v30 = vmul.f32 1.442695, %v1094_v28  ;;  %v1102_v46 = vmul.f32 1.442695, %v1092_v38 }
 0x343   :  { %v1077_v31 = vpop.xlane.xlu0 %1076 }
 0x344   :  { %2168 = vpow2.f32 %v1106_v30  ;;  %v1093_v32 = vsub.f32 %v1061_v5, %v1077_v31 }
 0x345   :  { %2170 = vpow2.f32 %v1098_v29 }
 0x346   :  { %v1104_v33 = vmul.f32 1.442695, %v1093_v32 }
 0x347   :  { %v1083_v34 = vpop.xlane.xlu0 %1082 }
 0x348   :  { %2172 = vpow2.f32 %v1104_v33  ;;  %v1095_v35 = vsub.f32 %v1063_v9, %v1083_v34 }
 0x34a   :  { %v2167_v36 = vpop.eup %2166  ;;  %v1108_v39 = vmul.f32 1.442695, %v1095_v35 }
 0x34b   :  { %v1086_v40 = vpop.xlane.xlu1 %1085  ;;  %v1089_v41 = vpop.xlane.xlu0 %1088  ;;  %v1117_v42 = vsel %vm465_vm2, %v2167_v36, 0.0 }
 0x34c   :  { %2174 = vpow2.f32 %v1108_v39  ;;  %v1096_v43 = vsub.f32 %v1064_v14, %v1086_v40  ;;  %v1097_v44 = vsub.f32 %v1065_v15, %v1089_v41  ;;  %1118 = vadd.xlane.f32.xlu0 %v1117_v42  ;;  %v1785_v42 = vld [vmem:[%s2800_s9 + $0x10] sm:$0xff] }
 0x34e   :  { %v2169_v45 = vpop.eup %2168  ;;  %v1110_v47 = vmul.f32 1.442695, %v1096_v43  ;;  %v1112_v48 = vmul.f32 1.442695, %v1097_v44  ;;  %v1786_v43 = vld [vmem:[%s2800_s9 + $0x18] sm:$0xff] }
 0x34f   :  { %v447_v49 = vpop.permute.xlu1 %446  ;;  %v1126_v50 = vsel %vm465_vm2, %v2169_v45, 0.0  ;;  %v2171_v51 = vpop.eup %2170 }
 0x350   :  { %2176 = vpow2.f32 %v1110_v47  ;;  %1127 = vadd.xlane.f32.xlu1 %v1126_v50  ;;  %2072 = vmatpush3.msra.mxu1 %v447_v49  ;;  %v1114_v53 = vsel %vm465_vm2, %v2171_v51, 0.0  ;;  %v450_v0 = vpop.permute.xlu0 %449 }
 0x351   :  { %2178 = vpow2.f32 %v1112_v48  ;;  %2081 = vmatprep.subr.mxu1 %v2393_v24 }
 0x352   :  { %v2173_v52 = vpop.eup %2172  ;;  %2180 = vpow2.f32 %v1102_v46 }
 0x353   :  { %v1123_v54 = vsel %vm465_vm2, %v2173_v52, 0.0  ;;  %v453_v63 = vpop.permute.xlu1 %452 }
 0x354   :  { %1115 = vadd.xlane.f32.xlu1 %v1114_v53  ;;  %1124 = vadd.xlane.f32.xlu0 %v1123_v54 }
 0x356   :  { %v2175_v55 = vpop.eup %2174 }
 0x357   :  { %v1129_v56 = vsel %vm465_vm2, %v2175_v55, 0.0  ;;  %v457_v1 = vpop.permute.xlu1 %456 }
 0x358   :  { %1130 = vadd.xlane.f32.xlu0 %v1129_v56 }
 0x35a   :  { %v2177_v57 = vpop.eup %2176 }
 0x35b   :  { %v2681_v58 = vpop.eup %2178  ;;  %v1132_v59 = vsel %vm465_vm2, %v2177_v57, 0.0 }
 0x35c   :  { %v2684_v60 = vpop.eup %2180  ;;  %1133 = vadd.xlane.f32.xlu1 %v1132_v59  ;;  %v1135_v61 = vsel %vm465_vm2, %v2681_v58, 0.0 }
 0x35d   :  { %1136 = vadd.xlane.f32.xlu0 %v1135_v61  ;;  %v1120_v62 = vsel %vm465_vm2, %v2684_v60, 0.0 }
 0x360   :  { %1121 = vadd.xlane.f32.xlu1 %v1120_v62 }
 0x371   :  { %462 = vrot.lane.b32.xlu1 %v2629_v37, %s2397_s4  ;;  %s2399_s4 = smov 24  }
 0x373   :  { %459 = vrot.lane.b32.xlu0 %v2629_v37, %s2395_s7 }
 0x3d9   :  { %v1119_v2 = vpop.xlane.xlu0 %1118 }
 0x3da   :  { %2182 = vrcp.f32 %v1119_v2 }
 0x3dd   :  { %v1128_v3 = vpop.xlane.xlu1 %1127 }
 0x3de   :  { %2184 = vrcp.f32 %v1128_v3 }
 0x3e1   :  { %v1116_v4 = vpop.xlane.xlu1 %1115  ;;  %v1125_v5 = vpop.xlane.xlu0 %1124 }
 0x3e2   :  { %2186 = vrcp.f32 %v1116_v4 }
 0x3e3   :  { %2188 = vrcp.f32 %v1125_v5 }
 0x3e4   :  { %v2183_v6 = vpop.eup %2182 }
 0x3e5   :  { %v1147_v7 = vmul.f32 %v2183_v6, %v2167_v36  ;;  %v1131_v8 = vpop.xlane.xlu0 %1130  ;;  %v1784_v36 = vld [vmem:[%s2800_s9 + $0x8] sm:$0xff] }
 0x3e6   :  { %2190 = vrcp.f32 %v1131_v8 }
 0x3e7   :  { %1155 = vst.msk [vmem:[%s2803_s12 + $0x8] sm:$0xff] %vm465_vm2, %v1147_v7  ;;  %2074 = vmatmul.mubr.msk.f32.vlgmr.msra.gmra.mrb[14].mxu1 %vm465_vm2, %v1147_v7 }
 0x3e8   :  { %v2185_v9 = vpop.eup %2184  ;;  %2082 = vmatpush3.msra.mxu1 %v453_v63  ;;  %2083 = vmatprep.mubr.msk.f32.mxu1 %vm2394_vm1, %v2393_v24 }
 0x3e9   :  { %v1150_v10 = vmul.f32 %v2185_v9, %v2169_v45  ;;  %v1134_v11 = vpop.xlane.xlu1 %1133  ;;  %2091 = vmatprep.subr.mxu1 %v2393_v24  ;;  %v2145_v45 = vpack.c.bf16 %v1786_v43, %v1785_v42 }
 0x3ea   :  { %2192 = vrcp.f32 %v1134_v11  ;;  %v1137_v12 = vpop.xlane.xlu0 %1136 }
 0x3eb   :  { %1158 = vst.msk [vmem:[%s2803_s12 + $0x20] sm:$0xff] %vm465_vm2, %v1150_v10  ;;  %2194 = vrcp.f32 %v1137_v12 }
 0x3ec   :  { %v2187_v13 = vpop.eup %2186 }
 0x3ed   :  { %v2189_v14 = vpop.eup %2188  ;;  %v1146_v15 = vmul.f32 %v2187_v13, %v2171_v51  ;;  %v1122_v16 = vpop.xlane.xlu1 %1121 }
 0x3ee   :  { %v1149_v17 = vmul.f32 %v2189_v14, %v2173_v52  ;;  %2196 = vrcp.f32 %v1122_v16  ;;  %v460_v28 = vpop.permute.xlu0 %459 }
 0x3ef   :  { %1154 = vst.msk [vmem:[%s2803_s12] sm:$0xff] %vm465_vm2, %v1146_v15  ;;  %2069 = vmatmul.mubr.msk.f32.vlgmr.msra.gmra.mrb[8].mxu0 %vm465_vm2, %v1146_v15 }
 0x3f0   :  { %v2191_v18 = vpop.eup %2190  ;;  %1157 = vst.msk [vmem:[%s2803_s12 + $0x18] sm:$0xff] %vm465_vm2, %v1149_v17  ;;  %2077 = vmatpush3.msra.mxu0 %v450_v0  ;;  %2084 = vmatmul.mubr.msk.f32.vlgmr.msra.gmra.mrb[16].mxu1 %vm465_vm2, %v1149_v17 }
 0x3f1   :  { %v1151_v19 = vmul.f32 %v2191_v18, %v2175_v55  ;;  %2092 = vmatpush3.msra.mxu1 %v457_v1  ;;  %2093 = vmatprep.mubr.msk.f32.mxu1 %vm2394_vm1, %v2393_v24  ;;  %v463_v20 = vpop.permute.xlu1 %462 }
 0x3f2   :  { %2101 = vmatprep.subr.mxu1 %v2393_v24  ;;  %2078 = vmatprep.mubr.msk.f32.mxu0 %vm2394_vm1, %v2393_v24 }
 0x3f3   :  { %1159 = vst.msk [vmem:[%s2803_s12 + $0x28] sm:$0xff] %vm465_vm2, %v1151_v19  ;;  %2086 = vmatprep.subr.mxu0 %v2393_v24 }
 0x3f4   :  { %v2193_v21 = vpop.eup %2192  ;;  %2094 = vmatmul.mubr.msk.f32.vlgmr.msra.gmra.mrb[18].mxu1 %vm465_vm2, %v1151_v19 }
 0x3f5   :  { %v2195_v22 = vpop.eup %2194  ;;  %v1152_v23 = vmul.f32 %v2193_v21, %v2177_v57  ;;  %2102 = vmatpush3.msra.mxu1 %v463_v20  ;;  %2103 = vmatprep.mubr.msk.f32.mxu1 %vm2394_vm1, %v2393_v24 }
 0x3f6   :  { %v1153_v25 = vmul.f32 %v2195_v22, %v2681_v58  ;;  %v1934_v58 = vld [vmem:[%s2801_s10] ss:$0 sm:$0xff] }
 0x3f7   :  { %1160 = vst.msk [vmem:[%s2803_s12 + $0x30] sm:$0xff] %vm465_vm2, %v1152_v23 }
 0x3f8   :  { %v2197_v26 = vpop.eup %2196  ;;  %1161 = vst.msk [vmem:[%s2803_s12 + $0x38] sm:$0xff] %vm465_vm2, %v1153_v25  ;;  %2104 = vmatmul.mubr.msk.f32.vlgmr.msra.gmra.mrb[20].mxu1 %vm465_vm2, %v1153_v25 }
 0x3f9   :  { %v1148_v27 = vmul.f32 %v2197_v26, %v2684_v60 }
 0x3fb   :  { %1156 = vst.msk [vmem:[%s2803_s12 + $0x10] sm:$0xff] %vm465_vm2, %v1148_v27  ;;  %2079 = vmatmul.mubr.msk.f32.vlgmr.msra.gmra.mrb[10].mxu0 %vm465_vm2, %v1148_v27 }
 0x3fc   :  { %2087 = vmatpush3.msra.mxu0 %v2629_v37  ;;  %2088 = vmatprep.mubr.msk.f32.mxu0 %vm2394_vm1, %v2393_v24 }
 0x3fd   :  { %2096 = vmatprep.subr.mxu0 %v2393_v24 }
 0x3ff   :  { %2089 = vmatmul.mubr.msk.f32.vlgmr.msra.gmra.mrb[12].mxu0 %vm465_vm2, %v1150_v10 }
 0x400   :  { %2097 = vmatpush3.msra.mxu0 %v460_v28  ;;  %2098 = vmatprep.mubr.msk.f32.mxu0 %vm2394_vm1, %v2393_v24  ;;  %v1783_v24 = vld [vmem:[%s2800_s9] sm:$0xff] }
 0x401   :  { %v2141_v39 = vpack.c.bf16 %v1784_v36, %v1783_v24 }
 0x403   :  { %2099 = vmatmul.mubr.msk.f32.vlgmr.msra.gmra.mrb[14].mxu0 %vm465_vm2, %v1152_v23  ;;  %2142 = vmatprep.subr.bf16.mxu0 %v2141_v39 }
 0x404   :  { %2144 = vmatpush3.bf16.msra.mxu0 %v2141_v39 }
 0x405   :  { %2146 = vmatprep.subr.bf16.mxu0 %v2145_v45 }
 0x408   :  { %2148 = vmatpush3.bf16.msra.mxu0 %v2145_v45 }
 0x4ba   :  { %v1304_v29 = vpop.f32.mrb[14].mxu1 }
 0x4bb   :  { %1748 = vrot.lane.b32.xlu0 %v1304_v29, %s2387_s16  ;;  %v2075_v30 = vpop.f32.mrb[15].mxu1 }
 0x4c2   :  { %v1231_v31 = vpop.f32.mrb[8].mxu0 }
 0x4c3   :  { %1746 = vst.msk [vmem:[#allocation2] sm:$0xff] %vm465_vm2, %v1231_v31  ;;  %v1450_v37 = vpop.f32.mrb[16].mxu1  ;;  %v2070_v32 = vpop.f32.mrb[9].mxu0 }
 0x4c4   :  { %v2085_v33 = vpop.f32.mrb[17].mxu1 }
 0x4c7   :  { %v1596_v34 = vpop.f32.mrb[18].mxu1 }
 0x4c8   :  { %1767 = vrot.lane.b32.xlu0 %v1596_v34, %s2387_s16  ;;  %v2095_v35 = vpop.f32.mrb[19].mxu1 }
 0x4cb   :  { %v1742_v38 = vpop.f32.mrb[20].mxu1 }
 0x4cc   :  { %v2105_v40 = vpop.f32.mrb[21].mxu1 }
 0x4ce   :  { %v1377_v41 = vpop.f32.mrb[10].mxu0 }
 0x4cf   :  { %1754 = vrot.lane.b32.xlu1 %v1377_v41, %s2398_s30  ;;  %v2080_v44 = vpop.f32.mrb[11].mxu0 }
 0x4d2   :  { %v1523_v46 = vpop.f32.mrb[12].mxu0 }
 0x4d3   :  { %1765 = vst.msk [vmem:[#allocation2 + $0x8] sm:$0xff] %vm465_vm2, %v1523_v46  ;;  %v2090_v47 = vpop.f32.mrb[13].mxu0  ;;  %1760 = vrot.lane.b32.xlu1 %v1450_v37, %s2399_s4 }
 0x4d6   :  { %v1669_v48 = vpop.f32.mrb[14].mxu0 }
 0x4d7   :  { %v2100_v49 = vpop.f32.mrb[15].mxu0  ;;  %1772 = vrot.lane.b32.xlu0 %v1669_v48, %s2398_s30  ;;  %1777 = vrot.lane.b32.xlu1 %v1742_v38, %s2399_s4 }
 0x52d   :  { %v1749_v50 = vpop.permute.xlu0 %1748 }
 0x52e   :  { %1752 = vst.msk [vmem:[#allocation2] sm:$0xff] %vm1751_vm3, %v1749_v50 }
 0x53a   :  { %v1768_v51 = vpop.permute.xlu0 %1767 }
 0x53b   :  { %1770 = vst.msk [vmem:[#allocation2 + $0x8] sm:$0xff] %vm1751_vm3, %v1768_v51 }
 0x541   :  { %v1755_v52 = vpop.permute.xlu1 %1754 }
 0x542   :  { %1758 = vst.msk [vmem:[#allocation2] sm:$0xff] %vm1757_vm4, %v1755_v52 }
 0x545   :  { %v1761_v53 = vpop.permute.xlu1 %1760 }
 0x546   :  { %1764 = vst.msk [vmem:[#allocation2] sm:$0xff] %vm1763_vm5, %v1761_v53 }
 0x549   :  { %v1773_v54 = vpop.permute.xlu0 %1772  ;;  %v1778_v55 = vpop.permute.xlu1 %1777 }
 0x54a   :  { %1775 = vst.msk [vmem:[#allocation2 + $0x8] sm:$0xff] %vm1757_vm4, %v1773_v54 }
 0x54b   :  { %1780 = vst.msk [vmem:[#allocation2 + $0x8] sm:$0xff] %vm1763_vm5, %v1778_v55 }
 0x54d   :  { %v1781_v56 = vld [vmem:[#allocation2] sm:$0xff] }
 0x54e   :  { %2114 = vmatprep.mubr.msk.f32.mxu0 %vm151_vm0, %v1781_v56 }
 0x552   :  { %v1782_v57 = vld [vmem:[#allocation2 + $0x8] sm:$0xff] }
 0x553   :  { %2115 = vmatmul.mubr.msk.f32.vlgmr.msra.gmra.mrb[16].mxu0 %vm151_vm0, %v1782_v57 }
 0x626   :  { %v2116_v59 = vpop.f32.mrb[16].mxu0 }
 0x627   :  { %v1872_v60 = vadd.f32 %v2116_v59, %v1934_v58  ;;  %v1866_v61 = vpop.f32.mrb[17].mxu0 }
 0x628   :  { %v1867_v62 = vadd.f32 %v1934_v58, %v1866_v61 }
 0x629   :  { %1876 = vst.msk [vmem:[#allocation15 + $0x8] sm:$0xff] %vm151_vm0, %v1872_v60 }
 0x62a   :  { %1875 = vst.msk [vmem:[#allocation15] sm:$0xff] %vm151_vm0, %v1867_v62 }
 0x62b   :  { %2363 = shalt.err (!%p2360_p4)
}
 0x62c   :  { %s2364_s25 = scalar_lea.hbm %s2802_s11, 256 }
 0x62d   :  { %p2365_p5 = scmp.ne.s32.totalorder %s2802_s11, %s2364_s25  ;;  %p2368_p6 = scmp.lt.u32.totalorder %s2364_s25, %s2802_s11 }
 0x62f   :  { %p2370_p7 = pnand %p2368_p6, %p2365_p5 }
 0x631   :  { %2373 = shalt.err (!%p2370_p7)
}
 0x632   :  { %1888 = dma.vmem_to_hbm [thread:$0]  %s1883_s21, 256, %s2802_s11, [#allocation5], %s2386_s15, %s2386_s15, %s2387_s16  }
 0x633   :  { %2382 = dma.done.wait [#allocation5], 256  }
 0x634   :  { %2383 = vsyncadd [#allocation5], 4294967040 }
 0x635   :  { %1896 = vsyncpa [#allocation4], 1 }
 0x636   :  { %1897 = vsyncpa [#allocation7], 1 }
 0x637   :  { %1898 = vsyncpa [#allocation10], 1 }
 0x638   :  { %1899 = vsyncpa [#allocation13], 1 }
 0x639   :  { %1900 = vsyncpa [#allocation5], 1 }

</bundles_post_ra>
